<compile_context>
chip_gen: v7x
topology: tpu7x:2x2x1
jax: 0.10.0
libtpu: 0.0.40
codegen_flags: <defaults>
</compile_context>

<pallas_src>
import functools

import jax
import jax.numpy as jnp
from jax.experimental import pallas as pl
from jax.experimental.pallas import tpu as pltpu


def _round_up(x, m):
    return ((x + m - 1) // m) * m


def _multi_task_kernel(x_ref, w1_ref, b1_ref, wh_ref, bh_ref, out_ref, *, n_cls):
    # Shared layer: Linear + ReLU (MXU matmul, f32 accumulate).
    x = x_ref[...]
    shared = jnp.dot(x, w1_ref[...], preferred_element_type=jnp.float32)
    shared = jnp.maximum(shared + b1_ref[...], 0.0)

    # Fused heads: single matmul producing [TB, N_pad] = (cls | reg | zero-pad).
    heads = jnp.dot(shared, wh_ref[...], preferred_element_type=jnp.float32)
    heads = heads + bh_ref[...]

    # Softmax over the first n_cls lanes only, full lane width with a (1, N)
    # broadcasted mask (no lane slicing, no (TB, N) int32 temporary).
    is_cls = jax.lax.broadcasted_iota(jnp.int32, (1, heads.shape[1]), 1) < n_cls
    masked = jnp.where(is_cls, heads, -jnp.inf)
    m = jnp.max(masked, axis=1, keepdims=True)
    e = jnp.exp(masked - m)                       # exp(-inf) = 0 on non-cls lanes
    denom = jnp.sum(e, axis=1, keepdims=True)
    probs = e * pl.reciprocal(denom, approx=False)  # exact: kernel is mem-bound

    # cls lanes -> softmax probabilities; remaining lanes keep the linear
    # regression values (pad lanes are exactly 0 from the zero weight columns).
    out_ref[...] = jnp.where(is_cls, probs, heads).astype(out_ref.dtype)


def multi_task_forward(x, params, *, tb_max=1024, split_outputs=True):
    """x: [B, input_size] float32.

    split_outputs=True  -> (cls_probs [B, n_cls], reg [B, n_reg])
    split_outputs=False -> fused lane-padded block [B, N_pad] (cls | reg | 0),
                           avoiding the two post-kernel lane-slice copies.
    """
    w1, b1 = params["w1"], params["b1"]
    wh, bh = params["w_heads"], params["b_heads"]
    n_cls, n_reg = params["n_cls"], params["n_reg"]
    assert n_cls >= 1, "softmax head needs at least one class"

    B, F = x.shape
    H = w1.shape[1]
    N = wh.shape[1]  # fused-head width, already padded to a 128-lane multiple

    # Balanced batch tile: multiple of 8 sublanes, tiles as equal as possible,
    # so the ragged final tile wastes at most 7 rows (no near-full-tile pad).
    num_tiles = pl.cdiv(B, tb_max)
    TB = _round_up(pl.cdiv(B, num_tiles), 8)
    grid = (pl.cdiv(B, TB),)

    kernel = functools.partial(_multi_task_kernel, n_cls=n_cls)

    # VMEM budget: double-buffered x/out tiles + resident weights + kernel
    # temporaries, with 2x headroom, clamped to 48 MiB (safe on v7x's 64 MiB).
    weight_bytes = 4 * (F * H + H + H * N + N)
    io_bytes = 4 * 2 * TB * (F + N)
    tmp_bytes = 4 * TB * (H + 4 * N)
    vmem_limit = int(min(48 * 1024 * 1024,
                         max(16 * 1024 * 1024,
                             2 * (weight_bytes + io_bytes + tmp_bytes))))

    cost = pl.CostEstimate(
        flops=2 * B * (F * H + H * N),
        transcendentals=B * N,
        bytes_accessed=4 * (B * (F + N) + F * H + H + H * N + N),
    )

    def _call(weight_pipeline_mode):
        wkw = {} if weight_pipeline_mode is None else {
            "pipeline_mode": weight_pipeline_mode}
        out = pl.pallas_call(
            kernel,
            out_shape=jax.ShapeDtypeStruct((B, N), jnp.float32),
            grid=grid,
            in_specs=[
                # x: streamed per batch tile (default double-buffered pipeline).
                pl.BlockSpec((TB, F), lambda i: (i, 0)),
                # Weights / biases: VMEM-resident, constant index_map.
                pl.BlockSpec((F, H), lambda i: (0, 0), **wkw),
                pl.BlockSpec((1, H), lambda i: (0, 0), **wkw),
                pl.BlockSpec((H, N), lambda i: (0, 0), **wkw),
                pl.BlockSpec((1, N), lambda i: (0, 0), **wkw),
            ],
            out_specs=pl.BlockSpec((TB, N), lambda i: (i, 0)),  # lane-dense store
            compiler_params=pltpu.CompilerParams(
                dimension_semantics=("parallel",),   # shard batch tiles across TCs
                vmem_limit_bytes=vmem_limit,
            ),
            cost_estimate=cost,
        )(x, w1, b1, wh, bh)
        return jax.block_until_ready(out)

    try:
        # Single-buffer the never-refetched resident weights (halves their VMEM).
        out = _call(pl.Buffered(1))
    except Exception:
        # Fallback: default pipelining if buffer_count=1 is rejected.
        out = _call(None)

    if not split_outputs:
        return out
    cls = out[:, :n_cls]
    reg = out[:, n_cls:n_cls + n_reg]
    return cls, reg


def init_params(key, input_size, shared_hidden_size,
                classification_output_size, regression_output_size):
    """Synthetic init mimicking nn.Linear shapes (weights stored as [in, out])."""
    ks = jax.random.split(key, 6)

    def lin(kw, kb, fan_in, fan_out):
        bound = 1.0 / jnp.sqrt(fan_in)
        w = jax.random.uniform(kw, (fan_in, fan_out), jnp.float32, -bound, bound)
        b = jax.random.uniform(kb, (1, fan_out), jnp.float32, -bound, bound)
        return w, b

    w1, b1 = lin(ks[0], ks[1], input_size, shared_hidden_size)
    wc, bc = lin(ks[2], ks[3], shared_hidden_size, classification_output_size)
    wr, br = lin(ks[4], ks[5], shared_hidden_size, regression_output_size)

    # Fuse the two heads into one [H, N_pad] weight (and [1, N_pad] bias),
    # zero-padded to a 128-lane multiple so the kernel output is lane-dense.
    n_total = classification_output_size + regression_output_size
    n_pad = _round_up(n_total, 128)
    w_heads = jnp.zeros((shared_hidden_size, n_pad), jnp.float32)
    w_heads = w_heads.at[:, :classification_output_size].set(wc)
    w_heads = w_heads.at[:, classification_output_size:n_total].set(wr)
    b_heads = jnp.zeros((1, n_pad), jnp.float32)
    b_heads = b_heads.at[:, :classification_output_size].set(bc)
    b_heads = b_heads.at[:, classification_output_size:n_total].set(br)

    return {
        "w1": w1, "b1": b1,
        "w_heads": w_heads, "b_heads": b_heads,
        "n_cls": classification_output_size, "n_reg": regression_output_size,
        # originals kept only for the pure-JAX reference
        "wc": wc, "bc": bc, "wr": wr, "br": br,
    }


def reference_forward(x, params):
    shared = jnp.maximum(x @ params["w1"] + params["b1"], 0.0)
    logits = shared @ params["wc"] + params["bc"]
    cls = jax.nn.softmax(logits, axis=1)
    reg = shared @ params["wr"] + params["br"]
    return cls, reg


if __name__ == "__main__":
    # Small shapes consistent with the module's forward: x is [batch, input_size].
    batch = 8
    input_size = 32
    shared_hidden_size = 64
    classification_output_size = 16
    regression_output_size = 8

    key = jax.random.PRNGKey(0)
    kx, kp = jax.random.split(key)
    x = jax.random.normal(kx, (batch, input_size), jnp.float32)
    params = init_params(kp, input_size, shared_hidden_size,
                         classification_output_size, regression_output_size)

    cls_out, reg_out = multi_task_forward(x, params)
    jax.block_until_ready((cls_out, reg_out))

    # Verify against pure-JAX reference.
    cls_ref, reg_ref = reference_forward(x, params)
    assert cls_out.shape == (batch, classification_output_size)
    assert reg_out.shape == (batch, regression_output_size)
    assert jnp.allclose(cls_out, cls_ref, atol=1e-4, rtol=1e-4)
    assert jnp.allclose(reg_out, reg_ref, atol=1e-4, rtol=1e-4)
    # Softmax rows sum to ~1 (exact reciprocal now, tight tolerance).
    assert jnp.allclose(jnp.sum(cls_out, axis=1), 1.0, atol=1e-4)

    print("KERNEL_OK")
</pallas_src>

<mosaic_0001>
module attributes {stable_mosaic.version = 11 : i64} {
  func.func @_multi_task_kernel(%arg0: i32, %arg1: memref<8x32xf32, #tpu.memory_space<vmem>>, %arg2: memref<32x64xf32, #tpu.memory_space<vmem>>, %arg3: memref<1x64xf32, #tpu.memory_space<vmem>>, %arg4: memref<64x128xf32, #tpu.memory_space<vmem>>, %arg5: memref<1x128xf32, #tpu.memory_space<vmem>>, %arg6: memref<8x128xf32, #tpu.memory_space<vmem>>) attributes {dimension_semantics = [#tpu.dimension_semantics<parallel>], iteration_bounds = array<i64: 1>, scalar_prefetch = 0 : i64, scratch_operands = 0 : i64, tpu.core_type = #tpu.core_type<tc>, window_params = [{transform_indices = @transform_0, window_bounds = array<i64: 8, 32>}, {pipeline_mode = #tpu.pipeline_mode<synchronous>, transform_indices = @transform_1, window_bounds = array<i64: 32, 64>}, {pipeline_mode = #tpu.pipeline_mode<synchronous>, transform_indices = @transform_2, window_bounds = array<i64: 1, 64>}, {pipeline_mode = #tpu.pipeline_mode<synchronous>, transform_indices = @transform_3, window_bounds = array<i64: 64, 128>}, {pipeline_mode = #tpu.pipeline_mode<synchronous>, transform_indices = @transform_4, window_bounds = array<i64: 1, 128>}, {transform_indices = @transform_5, window_bounds = array<i64: 8, 128>}]} {
    %c0 = arith.constant 0 : index
    %c0_0 = arith.constant 0 : index
    %0 = vector.load %arg1[%c0, %c0_0] : memref<8x32xf32, #tpu.memory_space<vmem>>, vector<8x32xf32>
    %c0_1 = arith.constant 0 : index
    %c0_2 = arith.constant 0 : index
    %1 = vector.load %arg2[%c0_1, %c0_2] : memref<32x64xf32, #tpu.memory_space<vmem>>, vector<32x64xf32>
    %cst = arith.constant dense<0.000000e+00> : vector<8x64xf32>
    %2 = tpu.matmul %0, %1, %cst {dimension_numbers = #tpu.dot_dimension_numbers<[1], [0], [0], [1], [0, 0, 1, 1], [], []>} : vector<8x32xf32>, vector<32x64xf32>, vector<8x64xf32> -> vector<8x64xf32>
    %c0_3 = arith.constant 0 : index
    %c0_4 = arith.constant 0 : index
    %3 = vector.load %arg3[%c0_3, %c0_4] : memref<1x64xf32, #tpu.memory_space<vmem>>, vector<1x64xf32>
    %4 = vector.broadcast %3 : vector<1x64xf32> to vector<8x64xf32>
    %5 = arith.addf %2, %4 : vector<8x64xf32>
    %cst_5 = arith.constant 0.000000e+00 : f32
    %6 = vector.broadcast %cst_5 : f32 to vector<8x64xf32>
    %7 = arith.maximumf %5, %6 : vector<8x64xf32>
    %c0_6 = arith.constant 0 : index
    %c0_7 = arith.constant 0 : index
    %8 = vector.load %arg4[%c0_6, %c0_7] : memref<64x128xf32, #tpu.memory_space<vmem>>, vector<64x128xf32>
    %cst_8 = arith.constant dense<0.000000e+00> : vector<8x128xf32>
    %9 = tpu.matmul %7, %8, %cst_8 {dimension_numbers = #tpu.dot_dimension_numbers<[1], [0], [0], [1], [0, 0, 1, 1], [], []>} : vector<8x64xf32>, vector<64x128xf32>, vector<8x128xf32> -> vector<8x128xf32>
    %c0_9 = arith.constant 0 : index
    %c0_10 = arith.constant 0 : index
    %10 = vector.load %arg5[%c0_9, %c0_10] : memref<1x128xf32, #tpu.memory_space<vmem>>, vector<1x128xf32>
    %11 = vector.broadcast %10 : vector<1x128xf32> to vector<8x128xf32>
    %12 = arith.addf %9, %11 : vector<8x128xf32>
    %13 = tpu.iota {dimensions = array<i32: 1>} : vector<1x128xi32>
    %c16_i32 = arith.constant 16 : i32
    %14 = vector.broadcast %c16_i32 : i32 to vector<1x128xi32>
    %15 = arith.cmpi slt, %13, %14 : vector<1x128xi32>
    %cst_11 = arith.constant 0xFF800000 : f32
    %16 = vector.shape_cast %15 : vector<1x128xi1> to vector<1x128xi1>
    %17 = vector.broadcast %16 : vector<1x128xi1> to vector<8x128xi1>
    %18 = vector.broadcast %cst_11 : f32 to vector<8x128xf32>
    %19 = arith.select %17, %12, %18 : vector<8x128xi1>, vector<8x128xf32>
    %cst_12 = arith.constant dense<0xFF800000> : vector<8xf32>
    %20 = vector.multi_reduction <maximumf>, %19, %cst_12 [1] : vector<8x128xf32> to vector<8xf32>
    %21 = vector.shape_cast %20 : vector<8xf32> to vector<8x1xf32>
    %22 = vector.broadcast %21 : vector<8x1xf32> to vector<8x128xf32>
    %23 = arith.subf %19, %22 : vector<8x128xf32>
    %24 = math.exp %23 : vector<8x128xf32>
    %cst_13 = arith.constant dense<0.000000e+00> : vector<8xf32>
    %25 = vector.multi_reduction <add>, %24, %cst_13 [1] : vector<8x128xf32> to vector<8xf32>
    %26 = vector.shape_cast %25 : vector<8xf32> to vector<8x1xf32>
    %27 = tpu.reciprocal %26 : vector<8x1xf32> -> vector<8x1xf32>
    %28 = vector.broadcast %27 : vector<8x1xf32> to vector<8x128xf32>
    %29 = arith.mulf %24, %28 : vector<8x128xf32>
    %30 = vector.shape_cast %15 : vector<1x128xi1> to vector<1x128xi1>
    %31 = vector.broadcast %30 : vector<1x128xi1> to vector<8x128xi1>
    %32 = arith.select %31, %29, %12 : vector<8x128xi1>, vector<8x128xf32>
    %c0_14 = arith.constant 0 : index
    %c0_15 = arith.constant 0 : index
    %33 = vector.load %arg6[%c0_14, %c0_15] : memref<8x128xf32, #tpu.memory_space<vmem>>, vector<8x128xf32>
    tpu.vector_store %arg6[%c0_14, %c0_15], %32 {strides = array<i32>} : memref<8x128xf32, #tpu.memory_space<vmem>>, vector<8x128xf32>,
    return
  }
  func.func @transform_0(%arg0: i32) -> (i32, i32) {
    %c0_i32 = arith.constant 0 : i32
    %c0_i32_0 = arith.constant 0 : i32
    return %arg0, %c0_i32 : i32, i32
  }
  func.func @transform_1(%arg0: i32) -> (i32, i32) {
    %c0_i32 = arith.constant 0 : i32
    %c0_i32_0 = arith.constant 0 : i32
    %c0_i32_1 = arith.constant 0 : i32
    return %c0_i32, %c0_i32_0 : i32, i32
  }
  func.func @transform_2(%arg0: i32) -> (i32, i32) {
    %c0_i32 = arith.constant 0 : i32
    %c0_i32_0 = arith.constant 0 : i32
    %c0_i32_1 = arith.constant 0 : i32
    return %c0_i32, %c0_i32_0 : i32, i32
  }
  func.func @transform_3(%arg0: i32) -> (i32, i32) {
    %c0_i32 = arith.constant 0 : i32
    %c0_i32_0 = arith.constant 0 : i32
    %c0_i32_1 = arith.constant 0 : i32
    return %c0_i32, %c0_i32_0 : i32, i32
  }
  func.func @transform_4(%arg0: i32) -> (i32, i32) {
    %c0_i32 = arith.constant 0 : i32
    %c0_i32_0 = arith.constant 0 : i32
    %c0_i32_1 = arith.constant 0 : i32
    return %c0_i32, %c0_i32_0 : i32, i32
  }
  func.func @transform_5(%arg0: i32) -> (i32, i32) {
    %c0_i32 = arith.constant 0 : i32
    %c0_i32_0 = arith.constant 0 : i32
    return %arg0, %c0_i32 : i32, i32
  }
}

module attributes {stable_mosaic.version = 11 : i64} {
  func.func @_multi_task_kernel(%arg0: i32, %arg1: memref<8x32xf32, #tpu.memory_space<vmem>>, %arg2: memref<32x64xf32, #tpu.memory_space<vmem>>, %arg3: memref<1x64xf32, #tpu.memory_space<vmem>>, %arg4: memref<64x128xf32, #tpu.memory_space<vmem>>, %arg5: memref<1x128xf32, #tpu.memory_space<vmem>>, %arg6: memref<8x128xf32, #tpu.memory_space<vmem>>) attributes {dimension_semantics = [#tpu.dimension_semantics<parallel>], iteration_bounds = array<i64: 1>, scalar_prefetch = 0 : i64, scratch_operands = 0 : i64, tpu.core_type = #tpu.core_type<tc>, window_params = [{transform_indices = @transform_0, window_bounds = array<i64: 8, 32>}, {pipeline_mode = #tpu.pipeline_mode<synchronous>, transform_indices = @transform_1, window_bounds = array<i64: 32, 64>}, {pipeline_mode = #tpu.pipeline_mode<synchronous>, transform_indices = @transform_2, window_bounds = array<i64: 1, 64>}, {pipeline_mode = #tpu.pipeline_mode<synchronous>, transform_indices = @transform_3, window_bounds = array<i64: 64, 128>}, {pipeline_mode = #tpu.pipeline_mode<synchronous>, transform_indices = @transform_4, window_bounds = array<i64: 1, 128>}, {transform_indices = @transform_5, window_bounds = array<i64: 8, 128>}]} {
    %c0 = arith.constant 0 : index
    %c0_0 = arith.constant 0 : index
    %0 = vector.load %arg1[%c0, %c0_0] : memref<8x32xf32, #tpu.memory_space<vmem>>, vector<8x32xf32>
    %c0_1 = arith.constant 0 : index
    %c0_2 = arith.constant 0 : index
    %1 = vector.load %arg2[%c0_1, %c0_2] : memref<32x64xf32, #tpu.memory_space<vmem>>, vector<32x64xf32>
    %cst = arith.constant dense<0.000000e+00> : vector<8x64xf32>
    %2 = tpu.matmul %0, %1, %cst {dimension_numbers = #tpu.dot_dimension_numbers<[1], [0], [0], [1], [0, 0, 1, 1], [], []>} : vector<8x32xf32>, vector<32x64xf32>, vector<8x64xf32> -> vector<8x64xf32>
    %c0_3 = arith.constant 0 : index
    %c0_4 = arith.constant 0 : index
    %3 = vector.load %arg3[%c0_3, %c0_4] : memref<1x64xf32, #tpu.memory_space<vmem>>, vector<1x64xf32>
    %4 = vector.broadcast %3 : vector<1x64xf32> to vector<8x64xf32>
    %5 = arith.addf %2, %4 : vector<8x64xf32>
    %cst_5 = arith.constant 0.000000e+00 : f32
    %6 = vector.broadcast %cst_5 : f32 to vector<8x64xf32>
    %7 = arith.maximumf %5, %6 : vector<8x64xf32>
    %c0_6 = arith.constant 0 : index
    %c0_7 = arith.constant 0 : index
    %8 = vector.load %arg4[%c0_6, %c0_7] : memref<64x128xf32, #tpu.memory_space<vmem>>, vector<64x128xf32>
    %cst_8 = arith.constant dense<0.000000e+00> : vector<8x128xf32>
    %9 = tpu.matmul %7, %8, %cst_8 {dimension_numbers = #tpu.dot_dimension_numbers<[1], [0], [0], [1], [0, 0, 1, 1], [], []>} : vector<8x64xf32>, vector<64x128xf32>, vector<8x128xf32> -> vector<8x128xf32>
    %c0_9 = arith.constant 0 : index
    %c0_10 = arith.constant 0 : index
    %10 = vector.load %arg5[%c0_9, %c0_10] : memref<1x128xf32, #tpu.memory_space<vmem>>, vector<1x128xf32>
    %11 = vector.broadcast %10 : vector<1x128xf32> to vector<8x128xf32>
    %12 = arith.addf %9, %11 : vector<8x128xf32>
    %13 = tpu.iota {dimensions = array<i32: 1>} : vector<1x128xi32>
    %c16_i32 = arith.constant 16 : i32
    %14 = vector.broadcast %c16_i32 : i32 to vector<1x128xi32>
    %15 = arith.cmpi slt, %13, %14 : vector<1x128xi32>
    %cst_11 = arith.constant 0xFF800000 : f32
    %16 = vector.shape_cast %15 : vector<1x128xi1> to vector<1x128xi1>
    %17 = vector.broadcast %16 : vector<1x128xi1> to vector<8x128xi1>
    %18 = vector.broadcast %cst_11 : f32 to vector<8x128xf32>
    %19 = arith.select %17, %12, %18 : vector<8x128xi1>, vector<8x128xf32>
    %cst_12 = arith.constant dense<0xFF800000> : vector<8xf32>
    %20 = vector.multi_reduction <maximumf>, %19, %cst_12 [1] : vector<8x128xf32> to vector<8xf32>
    %21 = vector.shape_cast %20 : vector<8xf32> to vector<8x1xf32>
    %22 = vector.broadcast %21 : vector<8x1xf32> to vector<8x128xf32>
    %23 = arith.subf %19, %22 : vector<8x128xf32>
    %24 = math.exp %23 : vector<8x128xf32>
    %cst_13 = arith.constant dense<0.000000e+00> : vector<8xf32>
    %25 = vector.multi_reduction <add>, %24, %cst_13 [1] : vector<8x128xf32> to vector<8xf32>
    %26 = vector.shape_cast %25 : vector<8xf32> to vector<8x1xf32>
    %27 = tpu.reciprocal %26 : vector<8x1xf32> -> vector<8x1xf32>
    %28 = vector.broadcast %27 : vector<8x1xf32> to vector<8x128xf32>
    %29 = arith.mulf %24, %28 : vector<8x128xf32>
    %30 = vector.shape_cast %15 : vector<1x128xi1> to vector<1x128xi1>
    %31 = vector.broadcast %30 : vector<1x128xi1> to vector<8x128xi1>
    %32 = arith.select %31, %29, %12 : vector<8x128xi1>, vector<8x128xf32>
    %c0_14 = arith.constant 0 : index
    %c0_15 = arith.constant 0 : index
    %33 = vector.load %arg6[%c0_14, %c0_15] : memref<8x128xf32, #tpu.memory_space<vmem>>, vector<8x128xf32>
    tpu.vector_store %arg6[%c0_14, %c0_15], %32 {strides = array<i32>} : memref<8x128xf32, #tpu.memory_space<vmem>>, vector<8x128xf32>,
    return
  }
  func.func @transform_0(%arg0: i32) -> (i32, i32) {
    %c0_i32 = arith.constant 0 : i32
    %c0_i32_0 = arith.constant 0 : i32
    return %arg0, %c0_i32 : i32, i32
  }
  func.func @transform_1(%arg0: i32) -> (i32, i32) {
    %c0_i32 = arith.constant 0 : i32
    %c0_i32_0 = arith.constant 0 : i32
    %c0_i32_1 = arith.constant 0 : i32
    return %c0_i32, %c0_i32_0 : i32, i32
  }
  func.func @transform_2(%arg0: i32) -> (i32, i32) {
    %c0_i32 = arith.constant 0 : i32
    %c0_i32_0 = arith.constant 0 : i32
    %c0_i32_1 = arith.constant 0 : i32
    return %c0_i32, %c0_i32_0 : i32, i32
  }
  func.func @transform_3(%arg0: i32) -> (i32, i32) {
    %c0_i32 = arith.constant 0 : i32
    %c0_i32_0 = arith.constant 0 : i32
    %c0_i32_1 = arith.constant 0 : i32
    return %c0_i32, %c0_i32_0 : i32, i32
  }
  func.func @transform_4(%arg0: i32) -> (i32, i32) {
    %c0_i32 = arith.constant 0 : i32
    %c0_i32_0 = arith.constant 0 : i32
    %c0_i32_1 = arith.constant 0 : i32
    return %c0_i32, %c0_i32_0 : i32, i32
  }
  func.func @transform_5(%arg0: i32) -> (i32, i32) {
    %c0_i32 = arith.constant 0 : i32
    %c0_i32_0 = arith.constant 0 : i32
    return %arg0, %c0_i32 : i32, i32
  }
}

</mosaic_0001>

<bundles_post_ra>
// kernel: tpu_custom_call.1
= control target key start
LH: loop header
LB: loop body
LE: loop exit
PB: predicated region body
PF: predicated region fallthrough
CT: control target
= control target key end

     0   :  { %10 = vsyncpa [#allocation3], 0  ;;  %s543_s0 = inlined_call_operand.hbm [shape: f32[8,32], index: 0, kind: input, shape index: {}]   ;;  %s544_s1 = inlined_call_operand.hbm [shape: f32[32,64], index: 1, kind: input, shape index: {}]   ;;  %s545_s2 = inlined_call_operand.vmem [shape: f32[1,64], index: 2, kind: input, shape index: {}]   ;;  %s546_s3 = inlined_call_operand.hbm [shape: f32[64,128], index: 3, kind: input, shape index: {}]   ;;  %s547_s4 = inlined_call_operand.vmem [shape: f32[1,128], index: 4, kind: input, shape index: {}]   ;;  %s548_s5 = inlined_call_operand.hbm [shape: f32[8,128], index: 5, kind: output, shape index: {}]  }
   0x1   :  { %11 = vsyncpa [#allocation6], 0 }
   0x2   :  { %12 = vsyncpa [#allocation4], 0  ;;  %s442_s18 = smov [#allocation5]   ;;  %s348_s22 = scalar_lea.hbm %s544_s1, 512 }
   0x3   :  { %s28_s19 = sshll.u32 %s442_s18, 4  ;;  %p349_p0 = scmp.ne.s32.totalorder %s544_s1, %s348_s22  ;;  %s29_s19 = int_to_ptr.vmem [resolvable:$true] %s28_s19 }
   0x4   :  { %p352_p1 = scmp.lt.u32.totalorder %s348_s22, %s544_s1 }
   0x6   :  { %p354_p2 = pnand %p352_p1, %p349_p0 }
   0x8   :  { %357 = shalt.err (!%p354_p2)
}
   0x9   :  { %s358_s27 = scalar_lea.vmem %s29_s19, 512  ;;  %p363_p4 = scmp.lt.s32.totalorder %s29_s19, %s29_s19 }
   0xa   :  { %p359_p3 = scmp.ne.s32.totalorder %s29_s19, %s358_s27  ;;  %p364_p5 = scmp.lt.s32.totalorder %s358_s27, %s358_s27 }
   0xc   :  { %p365_p6 = por %p364_p5, %p363_p4 }
   0xe   :  { %p366_p7 = pnand %p365_p6, %p359_p3 }
  0x10   :  { %369 = shalt.err (!%p366_p7)
}
  0x11   :  { %s443_s28 = smov 128   ;;  %s444_s29 = smov 8  }
  0x12   :  { %34 = dma.hbm_to_vmem [thread:$0]  %s544_s1, 512, %s29_s19, [#allocation6], %s443_s28, %s443_s28, %s444_s29  }
  0x13   :  { %s445_s7 = smov [#allocation2]   ;;  %s446_s9 = smov [#allocation7]  }
  0x14   :  { %s19_s8 = sshll.u32 %s445_s7, 4  ;;  %s42_s10 = sshll.u32 %s446_s9, 4  ;;  %s20_s8 = int_to_ptr.vmem [resolvable:$true] %s19_s8  ;;  %s43_s10 = int_to_ptr.vmem [resolvable:$true] %s42_s10 }
  0x15   :  { %s370_s13 = scalar_lea.hbm %s543_s0, 128 }
  0x16   :  { %p371_p8 = scmp.ne.s32.totalorder %s543_s0, %s370_s13  ;;  %p374_p9 = scmp.lt.u32.totalorder %s370_s13, %s543_s0 }
  0x18   :  { %p376_p10 = pnand %p374_p9, %p371_p8 }
  0x1a   :  { %379 = shalt.err (!%p376_p10)
}
  0x1b   :  { %s380_s1 = scalar_lea.vmem %s20_s8, 128  ;;  %p385_p12 = scmp.lt.s32.totalorder %s20_s8, %s20_s8 }
  0x1c   :  { %p381_p11 = scmp.ne.s32.totalorder %s20_s8, %s380_s1  ;;  %p386_p13 = scmp.lt.s32.totalorder %s380_s1, %s380_s1 }
  0x1e   :  { %p387_p0 = por %p386_p13, %p385_p12 }
  0x20   :  { %p388_p1 = pnand %p387_p0, %p381_p11 }
  0x22   :  { %391 = shalt.err (!%p388_p1)
}
  0x23   :  { %22 = dma.hbm_to_vmem [thread:$0]  %s543_s0, 128, %s20_s8, [#allocation3]  }
  0x24   :  { %s392_s22 = scalar_lea.hbm %s546_s3, 1024 }
  0x25   :  { %p393_p2 = scmp.ne.s32.totalorder %s546_s3, %s392_s22  ;;  %p396_p3 = scmp.lt.u32.totalorder %s392_s22, %s546_s3 }
  0x27   :  { %p398_p4 = pnand %p396_p3, %p393_p2 }
  0x29   :  { %401 = shalt.err (!%p398_p4)
}
  0x2a   :  { %s402_s27 = scalar_lea.vmem %s43_s10, 1024  ;;  %p407_p6 = scmp.lt.s32.totalorder %s43_s10, %s43_s10 }
  0x2b   :  { %p403_p5 = scmp.ne.s32.totalorder %s43_s10, %s402_s27  ;;  %p408_p7 = scmp.lt.s32.totalorder %s402_s27, %s402_s27 }
  0x2d   :  { %p409_p8 = por %p408_p7, %p407_p6 }
  0x2f   :  { %p410_p9 = pnand %p409_p8, %p403_p5 }
  0x31   :  { %413 = shalt.err (!%p410_p9)
}
  0x32   :  { %48 = dma.hbm_to_vmem [thread:$0]  %s546_s3, 1024, %s43_s10, [#allocation6], %s443_s28, %s443_s28, %s444_s29  }
  0x33   :  { %436 = dma.done.wait [#allocation3], 128  }
  0x34   :  { %437 = vsyncadd [#allocation3], 4294967168 }
  0x35   :  { %438 = dma.done.wait [#allocation6], 1536  }
  0x36   :  { %439 = vsyncadd [#allocation6], 4294965760  ;;  %v447_v0 = vmov 0.0|0.0   ;;  %vm448_vm0 = vmmov 0   ;;  %v449_v1 = vmov 0.0   ;;  %v61_v2 = vld [vmem:[#allocation5] sm:$0xff]  ;;  %v236_v26 = vlaneseq }
  0x37   :  { %317 = vmatprep.subr.bf16.mxu0 %v447_v0  ;;  %295 = vmatprep.mubr.msk.f32.mxu0 %vm448_vm0, %v449_v1  ;;  %v62_v3 = vld [vmem:[#allocation5 + $0x8] sm:$0xff]  ;;  %v63_v4 = vld [vmem:[#allocation5 + $0x10] sm:$0xff]  ;;  %v64_v6 = vld [vmem:[#allocation5 + $0x18] sm:$0xff]  ;;  %vm72_vm1 = vcmask 261120   ;;  %vm162_vm2 = vcmask 523264  }
  0x38   :  { %323 = vmatprep.subr.bf16.mxu1 %v447_v0  ;;  %314 = vmatprep.mubr.msk.f32.mxu1 %vm448_vm0, %v449_v1  ;;  %v318_v5 = vpack.c.bf16 %v62_v3, %v61_v2  ;;  %v147_v7 = vld [vmem:[#allocation7] sm:$0xff]  ;;  %v148_v8 = vld [vmem:[#allocation7 + $0x8] sm:$0xff]  ;;  %v149_v9 = vld [vmem:[#allocation7 + $0x10] sm:$0xff]  ;;  %v321_v11 = vpack.c.bf16 %v64_v6, %v63_v4  ;;  %v237_v27 = vand.u32 127, %v236_v26 }
  0x39   :  { %v150_v10 = vld [vmem:[#allocation7 + $0x18] sm:$0xff]  ;;  %v324_v12 = vpack.c.bf16 %v148_v8, %v147_v7  ;;  %v151_v14 = vld [vmem:[#allocation7 + $0x20] sm:$0xff]  ;;  %v152_v15 = vld [vmem:[#allocation7 + $0x28] sm:$0xff] }
  0x3a   :  { %319 = vmatpush3.bf16.msra.mxu0 %v318_v5  ;;  %v327_v13 = vpack.c.bf16 %v150_v10, %v149_v9  ;;  %v60_v16 = vld [vmem:[#allocation2] sm:$0xff]  ;;  %v330_v17 = vpack.c.bf16 %v152_v15, %v151_v14  ;;  %v153_v18 = vld [vmem:[#allocation7 + $0x30] sm:$0xff]  ;;  %vm238_vm3 = vcmp.lt.s32.totalorder %v237_v27, 16 }
  0x3b   :  { %320 = vmatprep.subr.bf16.mxu0 %v447_v0  ;;  %325 = vmatpush3.bf16.msra.mxu1 %v324_v12  ;;  %v154_v19 = vld [vmem:[#allocation7 + $0x38] sm:$0xff] }
  0x3c   :  { %326 = vmatprep.subr.bf16.mxu1 %v447_v0  ;;  %v333_v20 = vpack.c.bf16 %v154_v19, %v153_v18  ;;  %v269_v21 = vld [vmem:[%s545_s2] ss:$0 sm:$0xff]  ;;  %s450_s2 = smov [#allocation8]  }
  0x3d   :  { %v271_v28 = vld [vmem:[%s547_s4] ss:$0 sm:$0xff]  ;;  %s259_s7 = sshll.u32 %s450_s2, 4  ;;  %s260_s7 = int_to_ptr.vmem [resolvable:$true] %s259_s7 }
  0x3e   :  { %322 = vmatpush3.bf16.msra.mxu0 %v321_v11  ;;  %s414_s4 = scalar_lea.vmem %s260_s7, 128  ;;  %p419_p11 = scmp.lt.s32.totalorder %s260_s7, %s260_s7 }
  0x3f   :  { %328 = vmatpush3.bf16.msra.mxu1 %v327_v13  ;;  %p415_p10 = scmp.ne.s32.totalorder %s260_s7, %s414_s4  ;;  %p420_p12 = scmp.lt.s32.totalorder %s414_s4, %s414_s4 }
  0x40   :  { %329 = vmatprep.subr.bf16.mxu1 %v447_v0 }
  0x41   :  { %296 = vmatmul.mubr.msk.f32.vlgmr.msra.gmra.mrb[0].mxu0 %vm72_vm1, %v60_v16  ;;  %p421_p13 = por %p420_p12, %p419_p11 }
  0x43   :  { %331 = vmatpush3.bf16.msra.mxu1 %v330_v17  ;;  %p422_p0 = pnand %p421_p13, %p415_p10 }
  0x44   :  { %332 = vmatprep.subr.bf16.mxu1 %v447_v0 }
  0x47   :  { %334 = vmatpush3.bf16.msra.mxu1 %v333_v20 }
 0x114   :  { %v142_v22 = vpop.f32.mrb[0].mxu0 }
 0x115   :  { %v143_v23 = vadd.f32 %v269_v21, %v142_v22  ;;  %v297_v24 = vpop.f32.mrb[1].mxu0 }
 0x117   :  { %v146_v25 = vmax.f32 %v143_v23, 0.0 }
 0x119   :  { %315 = vmatmul.mubr.msk.f32.vlgmr.msra.gmra.mrb[0].mxu1 %vm162_vm2, %v146_v25 }
 0x1ec   :  { %v232_v29 = vpop.f32.mrb[0].mxu1 }
 0x1ed   :  { %v233_v30 = vadd.f32 %v271_v28, %v232_v29  ;;  %v316_v31 = vpop.f32.mrb[1].mxu1 }
 0x1ef   :  { %v241_v32 = vsel %vm238_vm3, %v233_v30, -inf }
 0x1f0   :  { %242 = vmax.xlane.f32.xlu0 %v241_v32 }
 0x27d   :  { %v243_v33 = vpop.xlane.xlu0 %242 }
 0x27e   :  { %v244_v34 = vsub.f32 %v241_v32, %v243_v33 }
 0x280   :  { %v245_v35 = vmul.f32 1.442695, %v244_v34 }
 0x282   :  { %344 = vpow2.f32 %v245_v35 }
 0x28c   :  { %v345_v36 = vpop.eup %344 }
 0x28d   :  { %247 = vadd.xlane.f32.xlu0 %v345_v36 }
 0x31a   :  { %v248_v37 = vpop.xlane.xlu0 %247 }
 0x31b   :  { %346 = vrcp.f32 %v248_v37 }
 0x325   :  { %v347_v38 = vpop.eup %346 }
 0x326   :  { %v250_v39 = vmul.f32 %v347_v38, %v345_v36 }
 0x328   :  { %v251_v40 = vsel %vm238_vm3, %v250_v39, %v233_v30 }
 0x329   :  { %252 = vst [vmem:[#allocation8] sm:$0xff] %v251_v40 }
 0x32a   :  { %425 = shalt.err (!%p422_p0)
}
 0x32b   :  { %s426_s10 = scalar_lea.hbm %s548_s5, 128 }
 0x32c   :  { %p427_p1 = scmp.ne.s32.totalorder %s548_s5, %s426_s10  ;;  %p430_p2 = scmp.lt.u32.totalorder %s426_s10, %s548_s5 }
 0x32e   :  { %p432_p3 = pnand %p430_p2, %p427_p1 }
 0x330   :  { %435 = shalt.err (!%p432_p3)
}
 0x331   :  { %262 = dma.vmem_to_hbm [thread:$0]  %s260_s7, 128, %s548_s5, [#allocation4]  }
 0x332   :  { %440 = dma.done.wait [#allocation4], 128  }
 0x333   :  { %441 = vsyncadd [#allocation4], 4294967168 }
 0x334   :  { %266 = vsyncpa [#allocation3], 1 }
 0x335   :  { %267 = vsyncpa [#allocation6], 1 }
 0x336   :  { %268 = vsyncpa [#allocation4], 1 }

// kernel: tpu_custom_call.1
= control target key start
LH: loop header
LB: loop body
LE: loop exit
PB: predicated region body
PF: predicated region fallthrough
CT: control target
= control target key end

     0   :  { %10 = vsyncpa [#allocation3], 0  ;;  %s543_s0 = inlined_call_operand.hbm [shape: f32[8,32], index: 0, kind: input, shape index: {}]   ;;  %s544_s1 = inlined_call_operand.hbm [shape: f32[32,64], index: 1, kind: input, shape index: {}]   ;;  %s545_s2 = inlined_call_operand.vmem [shape: f32[1,64], index: 2, kind: input, shape index: {}]   ;;  %s546_s3 = inlined_call_operand.hbm [shape: f32[64,128], index: 3, kind: input, shape index: {}]   ;;  %s547_s4 = inlined_call_operand.vmem [shape: f32[1,128], index: 4, kind: input, shape index: {}]   ;;  %s548_s5 = inlined_call_operand.hbm [shape: f32[8,128], index: 5, kind: output, shape index: {}]  }
   0x1   :  { %11 = vsyncpa [#allocation6], 0 }
   0x2   :  { %12 = vsyncpa [#allocation4], 0  ;;  %s442_s18 = smov [#allocation5]   ;;  %s348_s22 = scalar_lea.hbm %s544_s1, 512 }
   0x3   :  { %s28_s19 = sshll.u32 %s442_s18, 4  ;;  %p349_p0 = scmp.ne.s32.totalorder %s544_s1, %s348_s22  ;;  %s29_s19 = int_to_ptr.vmem [resolvable:$true] %s28_s19 }
   0x4   :  { %p352_p1 = scmp.lt.u32.totalorder %s348_s22, %s544_s1 }
   0x6   :  { %p354_p2 = pnand %p352_p1, %p349_p0 }
   0x8   :  { %357 = shalt.err (!%p354_p2)
}
   0x9   :  { %s358_s27 = scalar_lea.vmem %s29_s19, 512  ;;  %p363_p4 = scmp.lt.s32.totalorder %s29_s19, %s29_s19 }
   0xa   :  { %p359_p3 = scmp.ne.s32.totalorder %s29_s19, %s358_s27  ;;  %p364_p5 = scmp.lt.s32.totalorder %s358_s27, %s358_s27 }
   0xc   :  { %p365_p6 = por %p364_p5, %p363_p4 }
   0xe   :  { %p366_p7 = pnand %p365_p6, %p359_p3 }
  0x10   :  { %369 = shalt.err (!%p366_p7)
}
  0x11   :  { %s443_s28 = smov 128   ;;  %s444_s29 = smov 8  }
  0x12   :  { %34 = dma.hbm_to_vmem [thread:$0]  %s544_s1, 512, %s29_s19, [#allocation6], %s443_s28, %s443_s28, %s444_s29  }
  0x13   :  { %s445_s7 = smov [#allocation2]   ;;  %s446_s9 = smov [#allocation7]  }
  0x14   :  { %s19_s8 = sshll.u32 %s445_s7, 4  ;;  %s42_s10 = sshll.u32 %s446_s9, 4  ;;  %s20_s8 = int_to_ptr.vmem [resolvable:$true] %s19_s8  ;;  %s43_s10 = int_to_ptr.vmem [resolvable:$true] %s42_s10 }
  0x15   :  { %s370_s13 = scalar_lea.hbm %s543_s0, 128 }
  0x16   :  { %p371_p8 = scmp.ne.s32.totalorder %s543_s0, %s370_s13  ;;  %p374_p9 = scmp.lt.u32.totalorder %s370_s13, %s543_s0 }
  0x18   :  { %p376_p10 = pnand %p374_p9, %p371_p8 }
  0x1a   :  { %379 = shalt.err (!%p376_p10)
}
  0x1b   :  { %s380_s1 = scalar_lea.vmem %s20_s8, 128  ;;  %p385_p12 = scmp.lt.s32.totalorder %s20_s8, %s20_s8 }
  0x1c   :  { %p381_p11 = scmp.ne.s32.totalorder %s20_s8, %s380_s1  ;;  %p386_p13 = scmp.lt.s32.totalorder %s380_s1, %s380_s1 }
  0x1e   :  { %p387_p0 = por %p386_p13, %p385_p12 }
  0x20   :  { %p388_p1 = pnand %p387_p0, %p381_p11 }
  0x22   :  { %391 = shalt.err (!%p388_p1)
}
  0x23   :  { %22 = dma.hbm_to_vmem [thread:$0]  %s543_s0, 128, %s20_s8, [#allocation3]  }
  0x24   :  { %s392_s22 = scalar_lea.hbm %s546_s3, 1024 }
  0x25   :  { %p393_p2 = scmp.ne.s32.totalorder %s546_s3, %s392_s22  ;;  %p396_p3 = scmp.lt.u32.totalorder %s392_s22, %s546_s3 }
  0x27   :  { %p398_p4 = pnand %p396_p3, %p393_p2 }
  0x29   :  { %401 = shalt.err (!%p398_p4)
}
  0x2a   :  { %s402_s27 = scalar_lea.vmem %s43_s10, 1024  ;;  %p407_p6 = scmp.lt.s32.totalorder %s43_s10, %s43_s10 }
  0x2b   :  { %p403_p5 = scmp.ne.s32.totalorder %s43_s10, %s402_s27  ;;  %p408_p7 = scmp.lt.s32.totalorder %s402_s27, %s402_s27 }
  0x2d   :  { %p409_p8 = por %p408_p7, %p407_p6 }
  0x2f   :  { %p410_p9 = pnand %p409_p8, %p403_p5 }
  0x31   :  { %413 = shalt.err (!%p410_p9)
}
  0x32   :  { %48 = dma.hbm_to_vmem [thread:$0]  %s546_s3, 1024, %s43_s10, [#allocation6], %s443_s28, %s443_s28, %s444_s29  }
  0x33   :  { %436 = dma.done.wait [#allocation3], 128  }
  0x34   :  { %437 = vsyncadd [#allocation3], 4294967168 }
  0x35   :  { %438 = dma.done.wait [#allocation6], 1536  }
  0x36   :  { %439 = vsyncadd [#allocation6], 4294965760  ;;  %v447_v0 = vmov 0.0|0.0   ;;  %vm448_vm0 = vmmov 0   ;;  %v449_v1 = vmov 0.0   ;;  %v61_v2 = vld [vmem:[#allocation5] sm:$0xff]  ;;  %v236_v26 = vlaneseq }
  0x37   :  { %317 = vmatprep.subr.bf16.mxu0 %v447_v0  ;;  %295 = vmatprep.mubr.msk.f32.mxu0 %vm448_vm0, %v449_v1  ;;  %v62_v3 = vld [vmem:[#allocation5 + $0x8] sm:$0xff]  ;;  %v63_v4 = vld [vmem:[#allocation5 + $0x10] sm:$0xff]  ;;  %v64_v6 = vld [vmem:[#allocation5 + $0x18] sm:$0xff]  ;;  %vm72_vm1 = vcmask 261120   ;;  %vm162_vm2 = vcmask 523264  }
  0x38   :  { %323 = vmatprep.subr.bf16.mxu1 %v447_v0  ;;  %314 = vmatprep.mubr.msk.f32.mxu1 %vm448_vm0, %v449_v1  ;;  %v318_v5 = vpack.c.bf16 %v62_v3, %v61_v2  ;;  %v147_v7 = vld [vmem:[#allocation7] sm:$0xff]  ;;  %v148_v8 = vld [vmem:[#allocation7 + $0x8] sm:$0xff]  ;;  %v149_v9 = vld [vmem:[#allocation7 + $0x10] sm:$0xff]  ;;  %v321_v11 = vpack.c.bf16 %v64_v6, %v63_v4  ;;  %v237_v27 = vand.u32 127, %v236_v26 }
  0x39   :  { %v150_v10 = vld [vmem:[#allocation7 + $0x18] sm:$0xff]  ;;  %v324_v12 = vpack.c.bf16 %v148_v8, %v147_v7  ;;  %v151_v14 = vld [vmem:[#allocation7 + $0x20] sm:$0xff]  ;;  %v152_v15 = vld [vmem:[#allocation7 + $0x28] sm:$0xff] }
  0x3a   :  { %319 = vmatpush3.bf16.msra.mxu0 %v318_v5  ;;  %v327_v13 = vpack.c.bf16 %v150_v10, %v149_v9  ;;  %v60_v16 = vld [vmem:[#allocation2] sm:$0xff]  ;;  %v330_v17 = vpack.c.bf16 %v152_v15, %v151_v14  ;;  %v153_v18 = vld [vmem:[#allocation7 + $0x30] sm:$0xff]  ;;  %vm238_vm3 = vcmp.lt.s32.totalorder %v237_v27, 16 }
  0x3b   :  { %320 = vmatprep.subr.bf16.mxu0 %v447_v0  ;;  %325 = vmatpush3.bf16.msra.mxu1 %v324_v12  ;;  %v154_v19 = vld [vmem:[#allocation7 + $0x38] sm:$0xff] }
  0x3c   :  { %326 = vmatprep.subr.bf16.mxu1 %v447_v0  ;;  %v333_v20 = vpack.c.bf16 %v154_v19, %v153_v18  ;;  %v269_v21 = vld [vmem:[%s545_s2] ss:$0 sm:$0xff]  ;;  %s450_s2 = smov [#allocation8]  }
  0x3d   :  { %v271_v28 = vld [vmem:[%s547_s4] ss:$0 sm:$0xff]  ;;  %s259_s7 = sshll.u32 %s450_s2, 4  ;;  %s260_s7 = int_to_ptr.vmem [resolvable:$true] %s259_s7 }
  0x3e   :  { %322 = vmatpush3.bf16.msra.mxu0 %v321_v11  ;;  %s414_s4 = scalar_lea.vmem %s260_s7, 128  ;;  %p419_p11 = scmp.lt.s32.totalorder %s260_s7, %s260_s7 }
  0x3f   :  { %328 = vmatpush3.bf16.msra.mxu1 %v327_v13  ;;  %p415_p10 = scmp.ne.s32.totalorder %s260_s7, %s414_s4  ;;  %p420_p12 = scmp.lt.s32.totalorder %s414_s4, %s414_s4 }
  0x40   :  { %329 = vmatprep.subr.bf16.mxu1 %v447_v0 }
  0x41   :  { %296 = vmatmul.mubr.msk.f32.vlgmr.msra.gmra.mrb[0].mxu0 %vm72_vm1, %v60_v16  ;;  %p421_p13 = por %p420_p12, %p419_p11 }
  0x43   :  { %331 = vmatpush3.bf16.msra.mxu1 %v330_v17  ;;  %p422_p0 = pnand %p421_p13, %p415_p10 }
  0x44   :  { %332 = vmatprep.subr.bf16.mxu1 %v447_v0 }
  0x47   :  { %334 = vmatpush3.bf16.msra.mxu1 %v333_v20 }
 0x114   :  { %v142_v22 = vpop.f32.mrb[0].mxu0 }
 0x115   :  { %v143_v23 = vadd.f32 %v269_v21, %v142_v22  ;;  %v297_v24 = vpop.f32.mrb[1].mxu0 }
 0x117   :  { %v146_v25 = vmax.f32 %v143_v23, 0.0 }
 0x119   :  { %315 = vmatmul.mubr.msk.f32.vlgmr.msra.gmra.mrb[0].mxu1 %vm162_vm2, %v146_v25 }
 0x1ec   :  { %v232_v29 = vpop.f32.mrb[0].mxu1 }
 0x1ed   :  { %v233_v30 = vadd.f32 %v271_v28, %v232_v29  ;;  %v316_v31 = vpop.f32.mrb[1].mxu1 }
 0x1ef   :  { %v241_v32 = vsel %vm238_vm3, %v233_v30, -inf }
 0x1f0   :  { %242 = vmax.xlane.f32.xlu0 %v241_v32 }
 0x27d   :  { %v243_v33 = vpop.xlane.xlu0 %242 }
 0x27e   :  { %v244_v34 = vsub.f32 %v241_v32, %v243_v33 }
 0x280   :  { %v245_v35 = vmul.f32 1.442695, %v244_v34 }
 0x282   :  { %344 = vpow2.f32 %v245_v35 }
 0x28c   :  { %v345_v36 = vpop.eup %344 }
 0x28d   :  { %247 = vadd.xlane.f32.xlu0 %v345_v36 }
 0x31a   :  { %v248_v37 = vpop.xlane.xlu0 %247 }
 0x31b   :  { %346 = vrcp.f32 %v248_v37 }
 0x325   :  { %v347_v38 = vpop.eup %346 }
 0x326   :  { %v250_v39 = vmul.f32 %v347_v38, %v345_v36 }
 0x328   :  { %v251_v40 = vsel %vm238_vm3, %v250_v39, %v233_v30 }
 0x329   :  { %252 = vst [vmem:[#allocation8] sm:$0xff] %v251_v40 }
 0x32a   :  { %425 = shalt.err (!%p422_p0)
}
 0x32b   :  { %s426_s10 = scalar_lea.hbm %s548_s5, 128 }
 0x32c   :  { %p427_p1 = scmp.ne.s32.totalorder %s548_s5, %s426_s10  ;;  %p430_p2 = scmp.lt.u32.totalorder %s426_s10, %s548_s5 }
 0x32e   :  { %p432_p3 = pnand %p430_p2, %p427_p1 }
 0x330   :  { %435 = shalt.err (!%p432_p3)
}
 0x331   :  { %262 = dma.vmem_to_hbm [thread:$0]  %s260_s7, 128, %s548_s5, [#allocation4]  }
 0x332   :  { %440 = dma.done.wait [#allocation4], 128  }
 0x333   :  { %441 = vsyncadd [#allocation4], 4294967168 }
 0x334   :  { %266 = vsyncpa [#allocation3], 1 }
 0x335   :  { %267 = vsyncpa [#allocation6], 1 }
 0x336   :  { %268 = vsyncpa [#allocation4], 1 }

</bundles_post_ra>
